<compile_context>
chip_gen: v7x
topology: tpu7x:2x2x1
jax: 0.10.0
libtpu: 0.0.40
codegen_flags: <defaults>
</compile_context>

<pallas_src>
import functools

import jax
import jax.numpy as jnp
import numpy as np
from jax.experimental import pallas as pl
from jax.experimental.pallas import tpu as pltpu


def _cdiv(a, b):
    return -(-a // b)


def _rup(a, b):
    return _cdiv(a, b) * b


# ---------------------------------------------------------------------------
# Kernels
# ---------------------------------------------------------------------------

def _se_fused_kernel(x_ref, w1t_ref, b1_ref, w2t_ref, b2_ref, o_ref, *, inv_hw):
    """Single-pass SE: pool + gate MLP + rescale on one (TB, C, HW) block."""
    # Phase 1: spatial pooling.  Lane-axis reduce goes to the XLU slot;
    # accumulate in f32 and scale by a compile-time reciprocal.
    pooled = jnp.sum(x_ref[...], axis=-1, dtype=jnp.float32) * inv_hw        # (TB, C)

    # Phase 2: tiny gate MLP.  MXU underutilization accepted (kernel is HBM-bound).
    s1 = jnp.dot(pooled, w1t_ref[...], preferred_element_type=jnp.float32) + b1_ref[...]
    s1 = s1 * jax.nn.sigmoid(s1)                                             # Swish
    s2 = jnp.dot(s1, w2t_ref[...], preferred_element_type=jnp.float32) + b2_ref[...]
    gate = jax.nn.sigmoid(s2).astype(x_ref.dtype)                            # (TB, C)

    # Phase 3: streamed rescale.  x_ref re-read here (tile not live across the
    # MLP) and the multiply runs in x's dtype so bf16 activations stay bf16.
    o_ref[...] = x_ref[...] * gate[:, :, None]


def _pool_gate_kernel(x_ref, w1t_ref, b1_ref, w2t_ref, b2_ref, gate_ref, *,
                      inv_hw, last_tile_valid, need_mask):
    """Two-phase / phase A: accumulate spatial sums over HW tiles, then gate MLP."""
    s = pl.program_id(1)
    n_s = pl.num_programs(1)

    xv = x_ref[...]
    if need_mask:
        # Zero the out-of-range lanes of the ragged last spatial tile.
        lane = jax.lax.broadcasted_iota(jnp.int32, xv.shape, 2)
        limit = jnp.where(s == n_s - 1, last_tile_valid, xv.shape[2])
        xv = jnp.where(lane < limit, xv, jnp.zeros_like(xv))
    psum = jnp.sum(xv, axis=-1, dtype=jnp.float32)                           # (TB, C)

    @pl.when(s == 0)
    def _():
        gate_ref[...] = jnp.zeros_like(gate_ref)

    gate_ref[...] += psum[:, :, None]                                        # (TB, C, 1)

    @pl.when(s == n_s - 1)
    def _():
        pooled = gate_ref[...][:, :, 0] * inv_hw                             # (TB, C)
        s1 = jnp.dot(pooled, w1t_ref[...], preferred_element_type=jnp.float32) + b1_ref[...]
        s1 = s1 * jax.nn.sigmoid(s1)
        s2 = jnp.dot(s1, w2t_ref[...], preferred_element_type=jnp.float32) + b2_ref[...]
        gate_ref[...] = jax.nn.sigmoid(s2)[:, :, None]


def _rescale_kernel(x_ref, gate_ref, o_ref):
    """Two-phase / phase B: o = x * gate, streamed over a (batch, HW-tile) grid."""
    gate = gate_ref[...].astype(x_ref.dtype)                                 # (TB, C, 1)
    o_ref[...] = x_ref[...] * gate


# ---------------------------------------------------------------------------
# Wrapper
# ---------------------------------------------------------------------------

def _vmem_capacity_bytes():
    try:
        return int(pltpu.get_tpu_info().vmem_capacity_bytes)
    except Exception:
        return 64 << 20   # conservative fallback (v7x per-core VMEM)


def squeeze_excitation(x, w1, b1, w2, b2, *,
                       _force_two_phase=False, _force_tb=None, _force_thw=None):
    """x: (B, C, H, W). w1: (R, C, 1, 1), b1: (R,), w2: (C, R, 1, 1), b2: (C,)."""
    B, C, H, W = x.shape
    R = w1.shape[0]
    HW = H * W
    itemsize = x.dtype.itemsize

    # Lane-dense (B, C, H*W) view — a free reshape for contiguous NCHW.  No HW
    # padding / unpadding in the wrapper (each would be a full extra HBM pass).
    x2 = x.reshape(B, C, HW)

    # 1x1 conv weights -> (in, out) matmul weights.
    w1t = jnp.transpose(w1.reshape(R, C))   # (C, R)
    w2t = jnp.transpose(w2.reshape(C, R))   # (R, C)
    b1r = b1.reshape(1, R)
    b2r = b2.reshape(1, C)

    # ---- per-generation VMEM budget ---------------------------------------
    vmem_cap = _vmem_capacity_bytes()          # 64 MiB (v7x/TC) or 128 MiB (v5e/v6e)
    multi_tc = vmem_cap < (100 << 20)          # 64-MiB-per-core chips have 2 TCs
    vmem_budget = (vmem_cap * 5) // 8          # ~40 MiB (v7x) / ~80 MiB (v5e, v6e)

    sub = max(8, 32 // itemsize)               # sublane packing (8 f32 / 16 bf16)
    c_pad = _rup(C, sub)
    hw_pad = _rup(HW, 128)
    param_vmem = 2 * 4 * (_rup(C, 8) * _rup(R, 128) + _rup(R, 8) * _rup(C, 128)
                          + 8 * _rup(R, 128) + 8 * _rup(C, 128))
    gate_vmem = 2 * c_pad * 128 * 4            # per batch-row gate footprint (x2 buf)

    # Largest double-buffer-safe block; bigger blocks show diminishing returns
    # past ~8-16 MiB (85%+ of HBM roofline), so cap at 16 MiB on 128-MiB chips.
    max_block_bytes = (vmem_budget - param_vmem - (2 << 20)) // 4
    max_block_bytes = int(min(max(max_block_bytes, 1 << 20), 16 << 20))

    bytes_per_b = c_pad * hw_pad * itemsize    # VMEM footprint of one (C, HW) slice

    if _force_tb is not None:
        TB = int(_force_tb)
    else:
        TB = max(1, min(B, max_block_bytes // max(bytes_per_b, 1)))
        # On 2-TensorCore chips keep >= 2 parallel batch steps when B allows it;
        # on single-TC chips (v5e/v6e) shrinking TB only adds per-step overhead.
        if multi_tc and B >= 2 and _cdiv(B, TB) < 2:
            TB = _cdiv(B, 2)
    grid_b = _cdiv(B, TB)

    fits_single_pass = bytes_per_b <= max_block_bytes
    # On 2-TC chips with B == 1 the two-phase rescale grid gives the second core
    # spatial tiles to stream (the store-heavy 2/3 of HBM traffic is parallel).
    mc_b1_split = (multi_tc and B == 1 and HW >= 256
                   and C * HW * itemsize >= (8 << 20))
    use_two_phase = _force_two_phase or (not fits_single_pass) or mc_b1_split

    def _vmem_limit(needed):
        # Never clamp below the actual footprint; block sizes are already derived
        # from the physical-VMEM budget so `needed` always fits the chip.
        return int(max(needed, min(32 << 20, vmem_budget)))

    # ---- single-pass fused path --------------------------------------------
    if not use_two_phase:
        block_bytes = TB * bytes_per_b
        vmem_needed = 4 * block_bytes + param_vmem + (1 << 20)
        out2 = pl.pallas_call(
            functools.partial(_se_fused_kernel, inv_hw=1.0 / float(HW)),
            out_shape=jax.ShapeDtypeStruct((B, C, HW), x.dtype),
            grid_spec=pltpu.PrefetchScalarGridSpec(
                num_scalar_prefetch=0,
                grid=(grid_b,),
                in_specs=[
                    pl.BlockSpec((TB, C, HW), lambda b: (b, 0, 0)),
                    pl.BlockSpec((C, R), lambda b: (0, 0)),
                    pl.BlockSpec((1, R), lambda b: (0, 0)),
                    pl.BlockSpec((R, C), lambda b: (0, 0)),
                    pl.BlockSpec((1, C), lambda b: (0, 0)),
                ],
                out_specs=pl.BlockSpec((TB, C, HW), lambda b: (b, 0, 0)),
            ),
            compiler_params=pltpu.CompilerParams(
                dimension_semantics=("parallel",),
                vmem_limit_bytes=_vmem_limit(vmem_needed),
            ),
        )(x2, w1t, b1r, w2t, b2r)
        return out2.reshape(B, C, H, W)

    # ---- two-phase path: spatially tiled pool+gate, then streamed rescale ---
    if _force_thw is not None:
        THW = int(_force_thw)
    else:
        lane_budget = max_block_bytes // max(TB * c_pad * itemsize, 1)
        THW = max(128, (lane_budget // 128) * 128)
        if mc_b1_split:
            # make sure the second TensorCore gets at least one spatial tile
            THW = min(THW, max(128, _rup(_cdiv(HW, 2), 128)))
    if THW >= HW:
        THW = HW                                   # full spatial dim in one tile
    n_hw = _cdiv(HW, THW)
    blk = TB * c_pad * _rup(THW, 128) * itemsize

    gate = pl.pallas_call(
        functools.partial(
            _pool_gate_kernel,
            inv_hw=1.0 / float(HW),
            last_tile_valid=HW - (n_hw - 1) * THW,
            need_mask=(HW % THW != 0),
        ),
        out_shape=jax.ShapeDtypeStruct((B, C, 1), jnp.float32),
        grid_spec=pltpu.PrefetchScalarGridSpec(
            num_scalar_prefetch=0,
            grid=(grid_b, n_hw),
            in_specs=[
                pl.BlockSpec((TB, C, THW), lambda b, s: (b, 0, s)),
                pl.BlockSpec((C, R), lambda b, s: (0, 0)),
                pl.BlockSpec((1, R), lambda b, s: (0, 0)),
                pl.BlockSpec((R, C), lambda b, s: (0, 0)),
                pl.BlockSpec((1, C), lambda b, s: (0, 0)),
            ],
            out_specs=pl.BlockSpec((TB, C, 1), lambda b, s: (b, 0, 0)),
        ),
        compiler_params=pltpu.CompilerParams(
            dimension_semantics=("parallel", "arbitrary"),
            vmem_limit_bytes=_vmem_limit(
                2 * blk + param_vmem + TB * gate_vmem + (1 << 20)),
        ),
    )(x2, w1t, b1r, w2t, b2r)

    out2 = pl.pallas_call(
        _rescale_kernel,
        out_shape=jax.ShapeDtypeStruct((B, C, HW), x.dtype),
        grid_spec=pltpu.PrefetchScalarGridSpec(
            num_scalar_prefetch=0,
            grid=(grid_b, n_hw),
            in_specs=[
                pl.BlockSpec((TB, C, THW), lambda b, s: (b, 0, s)),
                pl.BlockSpec((TB, C, 1), lambda b, s: (b, 0, 0)),
            ],
            out_specs=pl.BlockSpec((TB, C, THW), lambda b, s: (b, 0, s)),
        ),
        compiler_params=pltpu.CompilerParams(
            dimension_semantics=("parallel", "parallel"),
            vmem_limit_bytes=_vmem_limit(4 * blk + TB * gate_vmem + (1 << 20)),
        ),
    )(x2, gate)
    return out2.reshape(B, C, H, W)


# ---------------------------------------------------------------------------
# Reference + tests
# ---------------------------------------------------------------------------

def _reference(x, w1, b1, w2, b2):
    R = w1.shape[0]
    C = x.shape[1]
    pooled = x.mean(axis=(2, 3))                                   # (B, C)
    s1 = pooled @ w1.reshape(R, C).T + b1[None, :]                 # (B, R)
    s1 = s1 * jax.nn.sigmoid(s1)
    s2 = s1 @ w2.reshape(C, R).T + b2[None, :]                     # (B, C)
    gate = jax.nn.sigmoid(s2)
    return x * gate[:, :, None, None]


def _run_case(key, B, C, H, W, R, **kw):
    kx, k1, k2, k3, k4 = jax.random.split(key, 5)
    x = jax.random.normal(kx, (B, C, H, W), dtype=jnp.float32)
    w1 = jax.random.normal(k1, (R, C, 1, 1), dtype=jnp.float32) * 0.2
    b1 = jax.random.normal(k2, (R,), dtype=jnp.float32) * 0.1
    w2 = jax.random.normal(k3, (C, R, 1, 1), dtype=jnp.float32) * 0.2
    b2 = jax.random.normal(k4, (C,), dtype=jnp.float32) * 0.1

    out = jax.block_until_ready(squeeze_excitation(x, w1, b1, w2, b2, **kw))
    ref = _reference(x, w1, b1, w2, b2)
    assert out.shape == (B, C, H, W)
    np.testing.assert_allclose(np.asarray(out), np.asarray(ref),
                               rtol=1e-5, atol=1e-5)


if __name__ == "__main__":
    key = jax.random.PRNGKey(0)
    ks = jax.random.split(key, 4)

    # Primary small case (fused single-pass path, auto tiling).
    _run_case(ks[0], B=2, C=8, H=16, W=16, R=4)
    # Ragged batch tiling on the single-pass path (grid_b = cdiv(3, 2)).
    _run_case(ks[1], B=3, C=8, H=16, W=16, R=4, _force_tb=2)
    # Two-phase (spatially tiled) path, even spatial split.
    _run_case(ks[2], B=2, C=8, H=16, W=16, R=4,
              _force_two_phase=True, _force_thw=128)
    # Two-phase path with ragged batch AND ragged spatial tail (masked pooling).
    _run_case(ks[3], B=3, C=8, H=18, W=18, R=4,
              _force_two_phase=True, _force_thw=128, _force_tb=2)

    print("KERNEL_OK")
</pallas_src>

<mosaic_0001>
module attributes {stable_mosaic.version = 11 : i64} {
  func.func @_se_fused_kernel(%arg0: i32, %arg1: memref<1x8x256xf32, #tpu.memory_space<vmem>>, %arg2: memref<8x4xf32, #tpu.memory_space<vmem>>, %arg3: memref<1x4xf32, #tpu.memory_space<vmem>>, %arg4: memref<4x8xf32, #tpu.memory_space<vmem>>, %arg5: memref<1x8xf32, #tpu.memory_space<vmem>>, %arg6: memref<1x8x256xf32, #tpu.memory_space<vmem>>) attributes {dimension_semantics = [#tpu.dimension_semantics<parallel>], iteration_bounds = array<i64: 2>, scalar_prefetch = 0 : i64, scratch_operands = 0 : i64, tpu.core_type = #tpu.core_type<tc>, window_params = [{transform_indices = @transform_0, window_bounds = array<i64: 1, 8, 256>}, {pipeline_mode = #tpu.pipeline_mode<synchronous>, transform_indices = @transform_1, window_bounds = array<i64: 8, 4>}, {pipeline_mode = #tpu.pipeline_mode<synchronous>, transform_indices = @transform_2, window_bounds = array<i64: 1, 4>}, {pipeline_mode = #tpu.pipeline_mode<synchronous>, transform_indices = @transform_3, window_bounds = array<i64: 4, 8>}, {pipeline_mode = #tpu.pipeline_mode<synchronous>, transform_indices = @transform_4, window_bounds = array<i64: 1, 8>}, {transform_indices = @transform_5, window_bounds = array<i64: 1, 8, 256>}]} {
    %c0 = arith.constant 0 : index
    %c0_0 = arith.constant 0 : index
    %c0_1 = arith.constant 0 : index
    %0 = vector.load %arg1[%c0, %c0_0, %c0_1] : memref<1x8x256xf32, #tpu.memory_space<vmem>>, vector<1x8x256xf32>
    %cst = arith.constant dense<0.000000e+00> : vector<1x8xf32>
    %1 = vector.multi_reduction <add>, %0, %cst [2] : vector<1x8x256xf32> to vector<1x8xf32>
    %cst_2 = arith.constant 3.906250e-03 : f32
    %2 = vector.broadcast %cst_2 : f32 to vector<1x8xf32>
    %3 = arith.mulf %1, %2 : vector<1x8xf32>
    %c0_3 = arith.constant 0 : index
    %c0_4 = arith.constant 0 : index
    %4 = vector.load %arg2[%c0_3, %c0_4] : memref<8x4xf32, #tpu.memory_space<vmem>>, vector<8x4xf32>
    %cst_5 = arith.constant dense<0.000000e+00> : vector<1x4xf32>
    %5 = tpu.matmul %3, %4, %cst_5 {dimension_numbers = #tpu.dot_dimension_numbers<[1], [0], [0], [1], [0, 0, 1, 1], [], []>} : vector<1x8xf32>, vector<8x4xf32>, vector<1x4xf32> -> vector<1x4xf32>
    %c0_6 = arith.constant 0 : index
    %c0_7 = arith.constant 0 : index
    %6 = vector.load %arg3[%c0_6, %c0_7] : memref<1x4xf32, #tpu.memory_space<vmem>>, vector<1x4xf32>
    %7 = arith.addf %5, %6 : vector<1x4xf32>
    %8 = arith.negf %7 : vector<1x4xf32>
    %9 = math.exp %8 : vector<1x4xf32>
    %cst_8 = arith.constant 1.000000e+00 : f32
    %10 = vector.broadcast %cst_8 : f32 to vector<1x4xf32>
    %11 = arith.addf %10, %9 : vector<1x4xf32>
    %12 = arith.divf %10, %11 : vector<1x4xf32>
    %13 = arith.mulf %7, %12 : vector<1x4xf32>
    %c0_9 = arith.constant 0 : index
    %c0_10 = arith.constant 0 : index
    %14 = vector.load %arg4[%c0_9, %c0_10] : memref<4x8xf32, #tpu.memory_space<vmem>>, vector<4x8xf32>
    %cst_11 = arith.constant dense<0.000000e+00> : vector<1x8xf32>
    %15 = tpu.matmul %13, %14, %cst_11 {dimension_numbers = #tpu.dot_dimension_numbers<[1], [0], [0], [1], [0, 0, 1, 1], [], []>} : vector<1x4xf32>, vector<4x8xf32>, vector<1x8xf32> -> vector<1x8xf32>
    %c0_12 = arith.constant 0 : index
    %c0_13 = arith.constant 0 : index
    %16 = vector.load %arg5[%c0_12, %c0_13] : memref<1x8xf32, #tpu.memory_space<vmem>>, vector<1x8xf32>
    %17 = arith.addf %15, %16 : vector<1x8xf32>
    %18 = arith.negf %17 : vector<1x8xf32>
    %19 = math.exp %18 : vector<1x8xf32>
    %cst_14 = arith.constant 1.000000e+00 : f32
    %20 = vector.broadcast %cst_14 : f32 to vector<1x8xf32>
    %21 = arith.addf %20, %19 : vector<1x8xf32>
    %22 = arith.divf %20, %21 : vector<1x8xf32>
    %c0_15 = arith.constant 0 : index
    %c0_16 = arith.constant 0 : index
    %c0_17 = arith.constant 0 : index
    %23 = vector.load %arg1[%c0_15, %c0_16, %c0_17] : memref<1x8x256xf32, #tpu.memory_space<vmem>>, vector<1x8x256xf32>
    %24 = vector.shape_cast %22 : vector<1x8xf32> to vector<1x8x1xf32>
    %25 = vector.broadcast %24 : vector<1x8x1xf32> to vector<1x8x256xf32>
    %26 = arith.mulf %23, %25 : vector<1x8x256xf32>
    %c0_18 = arith.constant 0 : index
    %c0_19 = arith.constant 0 : index
    %c0_20 = arith.constant 0 : index
    %27 = vector.load %arg6[%c0_18, %c0_19, %c0_20] : memref<1x8x256xf32, #tpu.memory_space<vmem>>, vector<1x8x256xf32>
    tpu.vector_store %arg6[%c0_18, %c0_19, %c0_20], %26 {strides = array<i32>} : memref<1x8x256xf32, #tpu.memory_space<vmem>>, vector<1x8x256xf32>,
    return
  }
  func.func @transform_0(%arg0: i32) -> (i32, i32, i32) {
    %c0_i32 = arith.constant 0 : i32
    %c0_i32_0 = arith.constant 0 : i32
    %c0_i32_1 = arith.constant 0 : i32
    return %arg0, %c0_i32, %c0_i32_0 : i32, i32, i32
  }
  func.func @transform_1(%arg0: i32) -> (i32, i32) {
    %c0_i32 = arith.constant 0 : i32
    %c0_i32_0 = arith.constant 0 : i32
    %c0_i32_1 = arith.constant 0 : i32
    return %c0_i32, %c0_i32_0 : i32, i32
  }
  func.func @transform_2(%arg0: i32) -> (i32, i32) {
    %c0_i32 = arith.constant 0 : i32
    %c0_i32_0 = arith.constant 0 : i32
    %c0_i32_1 = arith.constant 0 : i32
    return %c0_i32, %c0_i32_0 : i32, i32
  }
  func.func @transform_3(%arg0: i32) -> (i32, i32) {
    %c0_i32 = arith.constant 0 : i32
    %c0_i32_0 = arith.constant 0 : i32
    %c0_i32_1 = arith.constant 0 : i32
    return %c0_i32, %c0_i32_0 : i32, i32
  }
  func.func @transform_4(%arg0: i32) -> (i32, i32) {
    %c0_i32 = arith.constant 0 : i32
    %c0_i32_0 = arith.constant 0 : i32
    %c0_i32_1 = arith.constant 0 : i32
    return %c0_i32, %c0_i32_0 : i32, i32
  }
  func.func @transform_5(%arg0: i32) -> (i32, i32, i32) {
    %c0_i32 = arith.constant 0 : i32
    %c0_i32_0 = arith.constant 0 : i32
    %c0_i32_1 = arith.constant 0 : i32
    return %arg0, %c0_i32, %c0_i32_0 : i32, i32, i32
  }
}

</mosaic_0001>

<bundles_post_ra>
// kernel: tpu_custom_call.1
= control target key start
LH: loop header
LB: loop body
LE: loop exit
PB: predicated region body
PF: predicated region fallthrough
CT: control target
= control target key end

     0   :  { %10 = vsyncpa [#allocation3], 0  ;;  %s918_s0 = inlined_call_operand.hbm [shape: f32[2,8,256], index: 0, kind: input, shape index: {}]   ;;  %s919_s1 = inlined_call_operand.vmem [shape: f32[8,4], index: 1, kind: input, shape index: {}]   ;;  %s920_s2 = inlined_call_operand.vmem [shape: f32[1,4], index: 2, kind: input, shape index: {}]   ;;  %s921_s3 = inlined_call_operand.vmem [shape: f32[4,8], index: 3, kind: input, shape index: {}]   ;;  %s922_s4 = inlined_call_operand.vmem [shape: f32[1,8], index: 4, kind: input, shape index: {}]   ;;  %s923_s5 = inlined_call_operand.hbm [shape: f32[2,8,256], index: 5, kind: output, shape index: {}]  }
   0x1   :  { %12 = vsyncpa [#allocation3 + $0x1], 0 }
   0x2   :  { %13 = vsyncpa [#allocation4], 0 }
   0x3   :  { %15 = vsyncpa [#allocation4 + $0x1], 0  ;;  %s741_s18 = smov 0   ;;  %s743_s19 = smov 0  }
   0x4   :  { %s745_s20 = smov 0   ;;  %s747_s21 = smov 0  }
   0x5 LB: > { %s762_s22 = sadd.s32 4294967295, %s705_s21   ;;  %s518_s23 = sadd.s32 4294967294, %s705_s21   ;;  %s705_s21 = sphi %s747_s21, %s938_s21   ;;  %s701_s20 = sphi %s745_s20, %s937_s20   ;;  %s697_s19 = sphi %s743_s19, %s936_s19   ;;  %s693_s18 = sphi %s741_s18, %s935_s18  }
   0x6   : > { %s766_s24 = sadd.s32 1, %s705_s21   ;;  %s28_s25 = sadd.s32 1, %s701_s20 }
   0x7   : > { %s25_s26 = ssub.s32 %s705_s21, %s766_s24  ;;  %p35_p0 = scmp.ne.s32.totalorder %s701_s20, %s697_s19 }
   0x8   : > { %p26_p1 = scmp.eq.s32.totalorder %s25_s26, 0  ;;  %p36_p2 = scmp.eq.s32.totalorder %s705_s21, 0 }
   0x9   : > { %p41_p3 = scmp.ne.s32.totalorder %s697_s19, %s693_s18  ;;  %p42_p4 = scmp.eq.s32.totalorder %s762_s22, 0 }
   0xa   : > { %s778_s27 = scalar_select %p26_p1, %s701_s20, %s28_s25  }
   0xb   : > { %p780_p5 = por %p36_p2, %p35_p0  ;;  %p784_p6 = por %p42_p4, %p41_p3 }
   0xc   : > { %p149_p7 = scmp.eq.s32.totalorder %s762_s22, 1  ;;  %p155_p8 = scmp.eq.s32.totalorder %s518_s23, 1 }
   0xd   : > { %p565_p10 = scmp.lt.s32.totalorder %s705_s21, 2  ;;  %s187_s7 = sand.u32 1, %s701_s20  }
   0xe   : > { %p791_p11 = por %p149_p7, %p35_p0  ;;  %p795_p12 = por %p155_p8, %p41_p3 }
   0xf   : > { %s537_s8 = sshll.u32 %s705_s21, 8  ;;  %s521_s9 = sshll.u32 %s187_s7, 4 }
  0x10   : > { %s927_s30 = scalar_select %p791_p11, 1, 0 }
  0x11   : > { %s928_s6 = scalar_select %p795_p12, 1, 0 }
  0x12   : > { %s804_s12 = scalar_lea.hbm %s918_s0, %s537_s8  ;;  %s191_s13 = scalar_lea.vmem [#allocation2], %s521_s9 }
  0x13   : > { %s199_s14 = sshll.u32 %s191_s13, 4  ;;  %p808_p13 = pnand %p565_p10, %p780_p5  ;;  %s812_s14 = int_to_ptr.vmem [resolvable:$true] %s199_s14 }
  0x14   : > { %s188_s16 = scalar_lea.sflag [#allocation3], %s187_s7  ;;  %s609_s17 = scalar_lea.hbm %s804_s12, 256 }
  0x15   : > { %p610_p2 = scmp.ne.s32.totalorder %s804_s12, %s609_s17  ;;  %p611_p3 = pneg %p808_p13 }
  0x16   : > { %s614_s26 = scalar_lea.hbm %s918_s0, 512  ;;  %p615_p5 = scmp.lt.u32.totalorder %s804_s12, %s918_s0 }
  0x17   : > { %p612_p4 = pnand %p611_p3, %p610_p2  ;;  %p616_p8 = scmp.lt.u32.totalorder %s614_s26, %s609_s17 }
  0x18   : > { %p618_p9 = scmp.lt.u32.totalorder %s609_s17, %s804_s12 }
  0x19   : > { %p613_p7 = pneg %p612_p4  ;;  %p617_p10 = por %p616_p8, %p615_p5 }
  0x1b   : > { %p619_p0 = por %p618_p9, %p617_p10 }
  0x1d   : > { %p620_p1 = pnand %p619_p0, %p613_p7 }
  0x1f   : > { %623 = shalt.err (!%p620_p1)
}
  0x20   : > { %s624_s7 = scalar_lea.vmem %s812_s14, 256  ;;  %s707_s9 = smov [#allocation2]  }
  0x21   : > { %p625_p2 = scmp.ne.s32.totalorder %s812_s14, %s624_s7  ;;  %s629_s10 = sshll.u32 %s707_s9, 4  ;;  %s630_s10 = int_to_ptr.vmem [resolvable:$false] %s629_s10 }
  0x22   : > { %s631_s11 = scalar_lea.vmem %s630_s10, 512  ;;  %p632_p11 = scmp.lt.s32.totalorder %s812_s14, %s630_s10 }
  0x23   : > { %p627_p4 = pnand %p625_p2, %p611_p3  ;;  %p633_p5 = scmp.lt.s32.totalorder %s631_s11, %s624_s7 }
  0x25   : > { %p628_p12 = pneg %p627_p4  ;;  %p634_p8 = por %p633_p5, %p632_p11 }
  0x27   : > { %p635_p9 = pnand %p634_p8, %p628_p12 }
  0x29   : > { %638 = shalt.err (!%p635_p9)
}
  0x2a   : > { %560 = dma.hbm_to_vmem [thread:$0]  (!%p808_p13), %s804_s12, 256, %s812_s14, %s188_s16  }
  0x2b   : > { %p930_p0 = scmp.lt.s32.totalorder %s705_s21, 3  ;;  %p931_p1 = scmp.ge.s32.totalorder %s705_s21, 1 }
  0x2d   : > { %p205_p3 = pnand %p931_p1, %p930_p0 }
  0x2e   : > { %s846_s13 = sand.u32 (!%p205_p3), 1, %s697_s19  }
  0x2f   : > { %208 = sbr.rel (%p205_p3) target bundleno = 819 (0x333), region = 40  ;;  %s525_s17 = sshll.u32 (!%p205_p3), %s846_s13, 4 }
  0x30   : > { %s211_s23 = scalar_lea.sflag (!%p205_p3), [#allocation3], %s846_s13  ;;  %s214_s15 = scalar_lea.vmem (!%p205_p3), [#allocation2], %s525_s17 }
  0x36   : > { %684 = dma.done.wait (%p784_p6), %s211_s23, 256  }
  0x37   : > { %686 = vsyncadd (%p784_p6), %s211_s23, 4294967040  ;;  %v241_v0 = vld [vmem:[%s214_s15] sm:$0xff]  ;;  %v242_v1 = vld [vmem:[%s214_s15 + $0x8] sm:$0xff]  ;;  %v708_v3 = vmov 0.0   ;;  %vm709_vm0 = vmmov 0   ;;  %v250_v5 = vlaneseq  ;;  %vm256_vm1 = vcmask 64512  }
  0x38   : > { %v243_v2 = vadd.f32 %v242_v1, %v241_v0  ;;  %543 = vmatprep.subr.mxu0 %v708_v3  ;;  %v247_v4 = vld [vmem:[%s919_s1] sm:$0xff]  ;;  %548 = vmatprep.subr.mxu1 %v708_v3  ;;  %vm342_vm2 = vcmask 1043456   ;;  %vm338_vm3 = vcmask 31744   ;;  %s538_s7 = sshll.u32 %s762_s22, 8  ;;  %s240_s9 = scalar_lea.vmem [#allocation5], %s525_s17 }
  0x39   : > { %544 = vmatpush3.msra.mxu0 %v247_v4  ;;  %545 = vmatprep.mubr.msk.f32.mxu0 %vm709_vm0, %v708_v3  ;;  %v251_v6 = vand.u32 127, %v250_v5  ;;  %v253_v7 = vshrl.u32 %v250_v5, 7  ;;  %v336_v12 = vld [vmem:[%s921_s3] sm:$0xf]  ;;  %s448_s10 = sshll.u32 %s240_s9, 4  ;;  %s874_s15 = scalar_lea.hbm %s923_s5, %s538_s7  ;;  %s876_s10 = int_to_ptr.vmem [resolvable:$true] %s448_s10 }
  0x3a   : > { %244 = vadd.xlane.f32.xlu0 %v243_v2  ;;  %550 = vmatprep.mubr.msk.f32.mxu1 %vm709_vm0, %v708_v3  ;;  %v248_v13 = vld [vmem:[%s920_s2] sm:$0x1]  ;;  %s434_s12 = scalar_lea.sflag [#allocation4], %s846_s13  ;;  %s639_s22 = scalar_lea.vmem %s876_s10, 256 }
  0x3b   : > { %v254_v8 = vsub.s32 %v251_v6, %v253_v7  ;;  %549 = vmatpush3.msk.msra.mxu1 %vm342_vm2, %v336_v12  ;;  %v337_v22 = vld [vmem:[%s922_s4] sm:$0x1]  ;;  %v424_v29 = vsub.s32 0, %v253_v7  ;;  %p640_p6 = scmp.ne.s32.totalorder %s876_s10, %s639_s22  ;;  %p932_p11 = scmp.ne.s32.totalorder %s927_s30, 0 }
  0x3c   : > { %s710_s17 = smov [#allocation5]  }
  0x3d   : > { %p641_p12 = pnand %p640_p6, %p932_p11  ;;  %s643_s14 = sshll.u32 %s710_s17, 4  ;;  %s644_s14 = int_to_ptr.vmem [resolvable:$false] %s643_s14 }
  0x3e   : > { %s645_s29 = scalar_lea.vmem %s644_s14, 512  ;;  %p646_p7 = scmp.lt.s32.totalorder %s876_s10, %s644_s14 }
  0x3f   : > { %p642_p13 = pneg %p641_p12  ;;  %p647_p10 = scmp.lt.s32.totalorder %s645_s29, %s639_s22 }
  0x41   : > { %p648_p2 = por %p647_p10, %p646_p7 }
  0x43   : > { %p649_p4 = pnand %p648_p2, %p642_p13 }
  0xc7   : > { %v245_v9 = vpop.xlane.xlu0 %244 }
  0xc8   : > { %v246_v10 = vmul.f32 0.00390625, %v245_v9 }
  0xca   : > { %v255_v11 = vrot.slane %v246_v10, %v254_v8 }
  0xcc   : > { %546 = vmatmul.mubr.msk.f32.vlgmr.msra.gmra.mrb[0].mxu0 %vm256_vm1, %v255_v11 }
 0x19f   : > { %v325_v14 = vpop.f32.mrb[0].mxu0 }
 0x1a0   : > { %v326_v15 = vadd.f32 %v325_v14, %v248_v13  ;;  %v547_v16 = vpop.f32.mrb[1].mxu0 }
 0x1a2   : > { %v528_v17 = vmul.f32 -1.442695, %v326_v15 }
 0x1a4   : > { %601 = vpow2.f32 %v528_v17 }
 0x1ae   : > { %v602_v18 = vpop.eup %601 }
 0x1af   : > { %v332_v19 = vadd.f32 1.0, %v602_v18 }
 0x1b1   : > { %603 = vrcp.f32 %v332_v19 }
 0x1bb   : > { %v604_v20 = vpop.eup %603 }
 0x1bc   : > { %v335_v21 = vmul.f32 %v604_v20, %v326_v15 }
 0x1be   : > { %551 = vmatmul.mubr.msk.f32.vlgmr.msra.gmra.mrb[0].mxu1 %vm338_vm3, %v335_v21 }
 0x291   : > { %v412_v23 = vpop.f32.mrb[0].mxu1 }
 0x292   : > { %v413_v24 = vadd.f32 %v412_v23, %v337_v22  ;;  %v552_v25 = vpop.f32.mrb[1].mxu1 }
 0x294   : > { %v531_v26 = vmul.f32 -1.442695, %v413_v24 }
 0x296   : > { %605 = vpow2.f32 %v531_v26 }
 0x2a0   : > { %v606_v27 = vpop.eup %605 }
 0x2a1   : > { %v419_v28 = vadd.f32 1.0, %v606_v27 }
 0x2a3   : > { %607 = vrcp.f32 %v419_v28 }
 0x2ad   : > { %v608_v30 = vpop.eup %607 }
 0x2ae   : > { %v425_v31 = vrot.slane %v608_v30, %v424_v29 }
 0x2b0   : > { %427 = vbcast.lane.b32.xlu0 %v425_v31, 256 }
 0x322   : > { %v428_v32 = vpop.permute.xlu0 %427 }
 0x323   : > { %v429_v33 = vmul.f32 %v428_v32, %v241_v0  ;;  %v430_v34 = vmul.f32 %v428_v32, %v242_v1 }
 0x325   : > { %431 = vst [vmem:[%s240_s9] sm:$0xff] %v429_v33  ;;  %432 = vst [vmem:[%s240_s9 + $0x8] sm:$0xff] %v430_v34 }
 0x326   : > { %652 = shalt.err (!%p649_p4)
}
 0x327   : > { %s653_s13 = scalar_lea.hbm %s874_s15, 256  ;;  %s657_s26 = scalar_lea.hbm %s923_s5, 512 }
 0x328   : > { %p654_p5 = scmp.ne.s32.totalorder %s874_s15, %s653_s13  ;;  %p658_p0 = scmp.lt.u32.totalorder %s874_s15, %s923_s5 }
 0x329   : > { %p659_p1 = scmp.lt.u32.totalorder %s657_s26, %s653_s13  ;;  %p661_p6 = scmp.lt.u32.totalorder %s653_s13, %s874_s15 }
 0x32a   : > { %p655_p8 = pnand %p654_p5, %p932_p11 }
 0x32b   : > { %p660_p3 = por %p659_p1, %p658_p0 }
 0x32c   : > { %p656_p9 = pneg %p655_p8 }
 0x32d   : > { %p662_p12 = por %p661_p6, %p660_p3 }
 0x32f   : > { %p663_p13 = pnand %p662_p12, %p656_p9 }
 0x331   : > { %666 = shalt.err (!%p663_p13)
}
 0x332   : > { %555 = dma.vmem_to_hbm [thread:$0]  (%p932_p11), %s876_s10, 256, %s874_s15, %s434_s12  }
 0x333 PF: > { %s460_s7 = sand.u32 1, %s693_s18   ;;  %p933_p7 = scmp.ne.s32.totalorder %s928_s6, 0 }
 0x334   : > { %p934_p10 = scmp.ge.s32.totalorder %s705_s21, 2  ;;  %s461_s9 = scalar_lea.sflag [#allocation4], %s460_s7 }
 0x336   : > { %p562_p2 = pnand %p934_p10, %p933_p7 }
 0x338   : > { %688 = dma.done.wait (!%p562_p2), %s461_s9, 256  }
 0x339   : > { %690 = vsyncadd (!%p562_p2), %s461_s9, 4294967040  ;;  %p18_p4 = scmp.ge.s32.totalorder %s766_s24, 4   ;;  %s935_s18 = smov %s697_s19 }
 0x33a   : > { %s936_s19 = smov %s701_s20  ;;  %s937_s20 = smov %s778_s27 }
 0x33b   : > { %s938_s21 = smov %s766_s24  ;;  %20 = sbr.rel (!%p18_p4) target bundleno = 5 (0x5), region = 85 }
 0x342   :  { %466 = vsyncpa [#allocation3], 1 }
 0x343   :  { %468 = vsyncpa [#allocation3 + $0x1], 1 }
 0x344   :  { %469 = vsyncpa [#allocation4], 1 }
 0x345   :  { %471 = vsyncpa [#allocation4 + $0x1], 1 }

</bundles_post_ra>
